<compile_context>
chip_gen: v5e
topology: v5e:2x2
jax: 0.10.0
libtpu: 0.0.40
codegen_flags: <defaults>
</compile_context>

<pallas_src>
import functools

import jax
import jax.numpy as jnp
from jax import lax
from jax.experimental import pallas as pl
from jax.experimental.pallas import tpu as pltpu

BN_EPS = 1e-5


def _round_up(x, m):
    return (x + m - 1) // m * m


def _vmem_limit_bytes():
    """Per-generation VMEM budget (v5e/v6e: 128 MiB, v7x: 64 MiB per core)."""
    cap = 64 * 1024 * 1024
    try:
        cap = int(getattr(pltpu.get_tpu_info(), "vmem_capacity_bytes", cap))
    except Exception:
        cap = 64 * 1024 * 1024
    return int(max(min(cap - 8 * 1024 * 1024, 96 * 1024 * 1024), 32 * 1024 * 1024))


def _pick_tm(m, k_pad, c_pad, vmem_limit):
    """Largest lane-aligned M tile whose double-buffered streams fit ~half the budget."""
    m_128 = _round_up(m, 128)
    budget = vmem_limit // 2

    def tile_bytes(tm):
        p1 = (2 * k_pad * tm * 2        # patches (bf16), double-buffered
              + 2 * c_pad * k_pad * 2   # weights (bf16), double-buffered constant block
              + 2 * c_pad * tm * 4      # conv out (f32), double-buffered
              + 4 * c_pad * 4)          # per-tile stats
        p2 = (4 * c_pad * tm * 4        # conv in + out (f32), double-buffered
              + 4 * c_pad * 4)          # scale / shift
        return max(p1, p2)

    tm = 128
    for cand in (256, 512, 1024, 2048, 4096):
        if tile_bytes(cand) <= budget:
            tm = cand
    return min(tm, m_128)


def _conv_stats_kernel(patches_ref, w_ref, conv_ref, sum_ref, sumsq_ref):
    """Phase 1: conv tile on the MXU + per-tile per-channel sum / sum-of-squares.

    patches: (K_pad, TM) bf16, w: (C_pad, K_pad) bf16,
    conv out: (C_pad, TM) f32, sum/sumsq out: (1, C_pad, 1) f32.
    """
    conv = jnp.dot(w_ref[...], patches_ref[...],
                   preferred_element_type=jnp.float32)          # (C_pad, TM) f32
    conv_ref[...] = conv            # issue the big store before the reductions
    sum_ref[...] = jnp.sum(conv, axis=1, keepdims=True)[None]
    sumsq_ref[...] = jnp.sum(conv * conv, axis=1, keepdims=True)[None]


def _bn_relu_kernel(conv_ref, scale_ref, shift_ref, out_ref):
    """Phase 2: y = relu(conv * scale + shift). Pure VPU, memory-bound."""
    y = conv_ref[...] * scale_ref[...] + shift_ref[...]
    out_ref[...] = jnp.maximum(y, 0.0).astype(out_ref.dtype)


def _im2col_km(x, kh, kw, stride, padding):
    """x: (N, C, H, W) NCHW -> patches (C*kh*kw, N*Ho*Wo) with K on the sublane axis."""
    n, c, h, w = x.shape
    xp = jnp.pad(x, ((0, 0), (0, 0), (padding, padding), (padding, padding)))
    hp, wp = h + 2 * padding, w + 2 * padding
    h_out = (hp - kh) // stride + 1
    w_out = (wp - kw) // stride + 1

    cols = []
    for i in range(kh):
        for j in range(kw):
            cols.append(xp[:, :, i:i + stride * h_out:stride,
                           j:j + stride * w_out:stride])        # (N, C, Ho, Wo)
    # (kh*kw, N, C, Ho, Wo) -> (C, kh*kw, N, Ho, Wo) -> (K, M);
    # K ordering (c, i, j) matches conv_w.reshape(C_out, C_in*KH*KW).
    patches = jnp.stack(cols, axis=0).transpose(2, 0, 1, 3, 4)
    patches = patches.reshape(c * kh * kw, n * h_out * w_out)
    return patches, h_out, w_out


@functools.partial(jax.jit, static_argnames=("stride", "padding", "out_dtype"))
def downsample_block(x, conv_w, conv_b, bn_gamma, bn_beta, *, stride, padding,
                     out_dtype=jnp.float32):
    """x: (N, C_in, H, W) NCHW; conv_w: (C_out, C_in, KH, KW) as in PyTorch."""
    del conv_b  # per-channel bias is exactly cancelled by train-mode BN mean subtraction
    n, c_in, _, _ = x.shape
    c_out, _, kh, kw = conv_w.shape

    patches, h_out, w_out = _im2col_km(x, kh, kw, stride, padding)
    k, m = patches.shape

    # Compact padding: K only to the bf16 sublane tile (16), C_out only to the
    # f32 sublane tile (8), M (lane axis) up to the chosen tile.
    k_pad = _round_up(k, 16)
    c_pad = _round_up(c_out, 8)
    vmem_limit = _vmem_limit_bytes()
    tm = _pick_tm(m, k_pad, c_pad, vmem_limit)
    m_pad = _round_up(m, tm)
    num_tiles = m_pad // tm

    mxu_dtype = jnp.bfloat16
    patches_p = jnp.zeros((k_pad, m_pad), mxu_dtype).at[:k, :m].set(
        patches.astype(mxu_dtype))
    w_p = jnp.zeros((c_pad, k_pad), mxu_dtype).at[:c_out, :k].set(
        conv_w.reshape(c_out, c_in * kh * kw).astype(mxu_dtype))

    # ---- Phase 1: conv + per-tile channel statistics (streamed over M) ----
    phase1_cost = pl.CostEstimate(
        flops=2 * m_pad * k_pad * c_pad,
        transcendentals=0,
        bytes_accessed=(m_pad * k_pad * 2 + k_pad * c_pad * 2
                        + m_pad * c_pad * 4 + num_tiles * 2 * c_pad * 4))

    conv_flat, tile_sum, tile_sumsq = pl.pallas_call(
        _conv_stats_kernel,
        out_shape=(jax.ShapeDtypeStruct((c_pad, m_pad), jnp.float32),
                   jax.ShapeDtypeStruct((num_tiles, c_pad, 1), jnp.float32),
                   jax.ShapeDtypeStruct((num_tiles, c_pad, 1), jnp.float32)),
        grid_spec=pltpu.PrefetchScalarGridSpec(
            num_scalar_prefetch=0,
            grid=(num_tiles,),
            in_specs=[
                pl.BlockSpec((k_pad, tm), lambda i: (0, i)),
                # Constant block; small in this layout so default double-buffering
                # is kept (single-buffering / one-shot scratch DMA would free
                # k_pad*c_pad*2 bytes for bigger tiles on very large convs).
                pl.BlockSpec((c_pad, k_pad), lambda i: (0, 0)),
            ],
            out_specs=[
                pl.BlockSpec((c_pad, tm), lambda i: (0, i)),
                pl.BlockSpec((1, c_pad, 1), lambda i: (i, 0, 0)),
                pl.BlockSpec((1, c_pad, 1), lambda i: (i, 0, 0)),
            ],
        ),
        compiler_params=pltpu.CompilerParams(
            dimension_semantics=("parallel",),
            vmem_limit_bytes=vmem_limit),
        cost_estimate=phase1_cost,
    )(patches_p, w_p)

    # ---- Tiny per-channel reduction + fused BN scale/shift (once, in XLA) ----
    inv_m = 1.0 / float(m)                         # true M; zero-padded columns add 0
    col_sum = jnp.sum(tile_sum[:, :, 0], axis=0)       # (C_pad,)
    col_sumsq = jnp.sum(tile_sumsq[:, :, 0], axis=0)   # (C_pad,)
    mean = col_sum * inv_m
    # Biased variance via E[x^2]-E[x]^2 in f32 (as PyTorch normalizes with).
    # TODO(synk): switch to a shifted / two-pass formulation if mean >> std at very large M.
    var = jnp.maximum(col_sumsq * inv_m - mean * mean, 0.0)
    gamma_p = jnp.zeros((c_pad,), jnp.float32).at[:c_out].set(bn_gamma.astype(jnp.float32))
    beta_p = jnp.zeros((c_pad,), jnp.float32).at[:c_out].set(bn_beta.astype(jnp.float32))
    scale = gamma_p * lax.rsqrt(var + BN_EPS)
    shift = beta_p - mean * scale
    scale = scale.reshape(c_pad, 1)
    shift = shift.reshape(c_pad, 1)

    # ---- Phase 2: normalize + ReLU (streamed over the same M tiles) ----
    out_itemsize = jnp.dtype(out_dtype).itemsize
    phase2_cost = pl.CostEstimate(
        flops=3 * m_pad * c_pad,
        transcendentals=0,
        bytes_accessed=m_pad * c_pad * (4 + out_itemsize) + 2 * c_pad * 4)

    out_flat = pl.pallas_call(
        _bn_relu_kernel,
        out_shape=jax.ShapeDtypeStruct((c_pad, m_pad), out_dtype),
        grid_spec=pltpu.PrefetchScalarGridSpec(
            num_scalar_prefetch=0,
            grid=(num_tiles,),
            in_specs=[
                pl.BlockSpec((c_pad, tm), lambda i: (0, i)),
                pl.BlockSpec((c_pad, 1), lambda i: (0, 0)),
                pl.BlockSpec((c_pad, 1), lambda i: (0, 0)),
            ],
            out_specs=pl.BlockSpec((c_pad, tm), lambda i: (0, i)),
        ),
        compiler_params=pltpu.CompilerParams(
            dimension_semantics=("parallel",),
            vmem_limit_bytes=vmem_limit),
        cost_estimate=phase2_cost,
    )(conv_flat, scale, shift)

    # Channel-major (C, M) -> NCHW to match the PyTorch module interface.
    # (Keep the (C, M) / NHWC layout and skip this transpose when chaining TPU kernels.)
    out = out_flat[:c_out, :m].reshape(c_out, n, h_out, w_out).transpose(1, 0, 2, 3)
    return out


def _reference(x, conv_w, conv_b, bn_gamma, bn_beta, *, stride, padding):
    """Pure-JAX f32 reference of the PyTorch forward (training-mode BatchNorm)."""
    conv = lax.conv_general_dilated(
        x.astype(jnp.float32), conv_w.astype(jnp.float32),
        window_strides=(stride, stride),
        padding=[(padding, padding), (padding, padding)],
        dimension_numbers=("NCHW", "OIHW", "NCHW"))
    conv = conv + conv_b.reshape(1, -1, 1, 1)
    mean = jnp.mean(conv, axis=(0, 2, 3), keepdims=True)
    var = jnp.mean((conv - mean) ** 2, axis=(0, 2, 3), keepdims=True)
    y = (conv - mean) * lax.rsqrt(var + BN_EPS)
    y = y * bn_gamma.reshape(1, -1, 1, 1) + bn_beta.reshape(1, -1, 1, 1)
    return jnp.maximum(y, 0.0)


if __name__ == "__main__":
    # DownsampleBlock(4, 8, 3, padding=1, stride=2) at small shapes.
    N, C_IN, H, W = 2, 4, 16, 16
    C_OUT, KH, KW = 8, 3, 3
    STRIDE, PADDING = 2, 1

    key = jax.random.PRNGKey(0)
    kx, kw_, kb = jax.random.split(key, 3)

    x = jax.random.normal(kx, (N, C_IN, H, W), dtype=jnp.float32)
    conv_w = jax.random.normal(kw_, (C_OUT, C_IN, KH, KW), dtype=jnp.float32) * 0.1
    conv_b = jax.random.normal(kb, (C_OUT,), dtype=jnp.float32) * 0.1
    bn_gamma = jnp.ones((C_OUT,), dtype=jnp.float32)   # PyTorch BatchNorm2d default
    bn_beta = jnp.zeros((C_OUT,), dtype=jnp.float32)   # PyTorch BatchNorm2d default

    out = downsample_block(x, conv_w, conv_b, bn_gamma, bn_beta,
                           stride=STRIDE, padding=PADDING)
    out = jax.block_until_ready(out)

    ref = _reference(x, conv_w, conv_b, bn_gamma, bn_beta,
                     stride=STRIDE, padding=PADDING)
    max_err = float(jnp.max(jnp.abs(out - ref)))
    assert out.shape == (N, C_OUT, H // STRIDE, W // STRIDE), out.shape
    # bf16 MXU operands vs f32 reference -> bf16-scale tolerance.
    assert jnp.allclose(out, ref, atol=3e-2, rtol=3e-2), max_err

    print("KERNEL_OK")
</pallas_src>

<mosaic_0001>
module attributes {stable_mosaic.version = 11 : i64} {
  func.func @_conv_stats_kernel(%arg0: i32, %arg1: memref<48x128xbf16, #tpu.memory_space<vmem>>, %arg2: memref<8x48xbf16, #tpu.memory_space<vmem>>, %arg3: memref<8x128xf32, #tpu.memory_space<vmem>>, %arg4: memref<1x8x1xf32, #tpu.memory_space<vmem>>, %arg5: memref<1x8x1xf32, #tpu.memory_space<vmem>>) attributes {dimension_semantics = [#tpu.dimension_semantics<parallel>], iteration_bounds = array<i64: 1>, scalar_prefetch = 0 : i64, scratch_operands = 0 : i64, tpu.core_type = #tpu.core_type<tc>, window_params = [{transform_indices = @transform_0, window_bounds = array<i64: 48, 128>}, {pipeline_mode = #tpu.pipeline_mode<synchronous>, transform_indices = @transform_1, window_bounds = array<i64: 8, 48>}, {transform_indices = @transform_2, window_bounds = array<i64: 8, 128>}, {transform_indices = @transform_3, window_bounds = array<i64: 1, 8, 1>}, {transform_indices = @transform_4, window_bounds = array<i64: 1, 8, 1>}]} {
    %c0 = arith.constant 0 : index
    %c0_0 = arith.constant 0 : index
    %0 = vector.load %arg2[%c0, %c0_0] : memref<8x48xbf16, #tpu.memory_space<vmem>>, vector<8x48xbf16>
    %c0_1 = arith.constant 0 : index
    %c0_2 = arith.constant 0 : index
    %1 = vector.load %arg1[%c0_1, %c0_2] : memref<48x128xbf16, #tpu.memory_space<vmem>>, vector<48x128xbf16>
    %cst = arith.constant dense<0.000000e+00> : vector<8x128xf32>
    %2 = tpu.matmul %0, %1, %cst {dimension_numbers = #tpu.dot_dimension_numbers<[1], [0], [0], [1], [0, 0, 1, 1], [], []>} : vector<8x48xbf16>, vector<48x128xbf16>, vector<8x128xf32> -> vector<8x128xf32>
    %c0_3 = arith.constant 0 : index
    %c0_4 = arith.constant 0 : index
    %3 = vector.load %arg3[%c0_3, %c0_4] : memref<8x128xf32, #tpu.memory_space<vmem>>, vector<8x128xf32>
    tpu.vector_store %arg3[%c0_3, %c0_4], %2 {strides = array<i32>} : memref<8x128xf32, #tpu.memory_space<vmem>>, vector<8x128xf32>,
    %cst_5 = arith.constant dense<0.000000e+00> : vector<8xf32>
    %4 = vector.multi_reduction <add>, %2, %cst_5 [1] : vector<8x128xf32> to vector<8xf32>
    %5 = vector.shape_cast %4 : vector<8xf32> to vector<8x1xf32>
    %6 = vector.shape_cast %5 : vector<8x1xf32> to vector<1x8x1xf32>
    %c0_6 = arith.constant 0 : index
    %c0_7 = arith.constant 0 : index
    %c0_8 = arith.constant 0 : index
    %7 = vector.load %arg4[%c0_6, %c0_7, %c0_8] : memref<1x8x1xf32, #tpu.memory_space<vmem>>, vector<1x8x1xf32>
    tpu.vector_store %arg4[%c0_6, %c0_7, %c0_8], %6 {strides = array<i32>} : memref<1x8x1xf32, #tpu.memory_space<vmem>>, vector<1x8x1xf32>,
    %8 = arith.mulf %2, %2 : vector<8x128xf32>
    %cst_9 = arith.constant dense<0.000000e+00> : vector<8xf32>
    %9 = vector.multi_reduction <add>, %8, %cst_9 [1] : vector<8x128xf32> to vector<8xf32>
    %10 = vector.shape_cast %9 : vector<8xf32> to vector<8x1xf32>
    %11 = vector.shape_cast %10 : vector<8x1xf32> to vector<1x8x1xf32>
    %c0_10 = arith.constant 0 : index
    %c0_11 = arith.constant 0 : index
    %c0_12 = arith.constant 0 : index
    %12 = vector.load %arg5[%c0_10, %c0_11, %c0_12] : memref<1x8x1xf32, #tpu.memory_space<vmem>>, vector<1x8x1xf32>
    tpu.vector_store %arg5[%c0_10, %c0_11, %c0_12], %11 {strides = array<i32>} : memref<1x8x1xf32, #tpu.memory_space<vmem>>, vector<1x8x1xf32>,
    return
  }
  func.func @transform_0(%arg0: i32) -> (i32, i32) {
    %c0_i32 = arith.constant 0 : i32
    %c0_i32_0 = arith.constant 0 : i32
    return %c0_i32, %arg0 : i32, i32
  }
  func.func @transform_1(%arg0: i32) -> (i32, i32) {
    %c0_i32 = arith.constant 0 : i32
    %c0_i32_0 = arith.constant 0 : i32
    %c0_i32_1 = arith.constant 0 : i32
    return %c0_i32, %c0_i32_0 : i32, i32
  }
  func.func @transform_2(%arg0: i32) -> (i32, i32) {
    %c0_i32 = arith.constant 0 : i32
    %c0_i32_0 = arith.constant 0 : i32
    return %c0_i32, %arg0 : i32, i32
  }
  func.func @transform_3(%arg0: i32) -> (i32, i32, i32) {
    %c0_i32 = arith.constant 0 : i32
    %c0_i32_0 = arith.constant 0 : i32
    %c0_i32_1 = arith.constant 0 : i32
    return %arg0, %c0_i32, %c0_i32_0 : i32, i32, i32
  }
  func.func @transform_4(%arg0: i32) -> (i32, i32, i32) {
    %c0_i32 = arith.constant 0 : i32
    %c0_i32_0 = arith.constant 0 : i32
    %c0_i32_1 = arith.constant 0 : i32
    return %arg0, %c0_i32, %c0_i32_0 : i32, i32, i32
  }
}

module attributes {stable_mosaic.version = 11 : i64} {
  func.func @_bn_relu_kernel(%arg0: i32, %arg1: memref<8x128xf32, #tpu.memory_space<vmem>>, %arg2: memref<8x1xf32, #tpu.memory_space<vmem>>, %arg3: memref<8x1xf32, #tpu.memory_space<vmem>>, %arg4: memref<8x128xf32, #tpu.memory_space<vmem>>) attributes {dimension_semantics = [#tpu.dimension_semantics<parallel>], iteration_bounds = array<i64: 1>, scalar_prefetch = 0 : i64, scratch_operands = 0 : i64, tpu.core_type = #tpu.core_type<tc>, window_params = [{transform_indices = @transform_0, window_bounds = array<i64: 8, 128>}, {pipeline_mode = #tpu.pipeline_mode<synchronous>, transform_indices = @transform_1, window_bounds = array<i64: 8, 1>}, {pipeline_mode = #tpu.pipeline_mode<synchronous>, transform_indices = @transform_2, window_bounds = array<i64: 8, 1>}, {transform_indices = @transform_3, window_bounds = array<i64: 8, 128>}]} {
    %c0 = arith.constant 0 : index
    %c0_0 = arith.constant 0 : index
    %0 = vector.load %arg1[%c0, %c0_0] : memref<8x128xf32, #tpu.memory_space<vmem>>, vector<8x128xf32>
    %c0_1 = arith.constant 0 : index
    %c0_2 = arith.constant 0 : index
    %1 = vector.load %arg2[%c0_1, %c0_2] : memref<8x1xf32, #tpu.memory_space<vmem>>, vector<8x1xf32>
    %2 = vector.broadcast %1 : vector<8x1xf32> to vector<8x128xf32>
    %3 = arith.mulf %0, %2 : vector<8x128xf32>
    %c0_3 = arith.constant 0 : index
    %c0_4 = arith.constant 0 : index
    %4 = vector.load %arg3[%c0_3, %c0_4] : memref<8x1xf32, #tpu.memory_space<vmem>>, vector<8x1xf32>
    %5 = vector.broadcast %4 : vector<8x1xf32> to vector<8x128xf32>
    %6 = arith.addf %3, %5 : vector<8x128xf32>
    %cst = arith.constant 0.000000e+00 : f32
    %7 = vector.broadcast %cst : f32 to vector<8x128xf32>
    %8 = arith.maximumf %6, %7 : vector<8x128xf32>
    %c0_5 = arith.constant 0 : index
    %c0_6 = arith.constant 0 : index
    %9 = vector.load %arg4[%c0_5, %c0_6] : memref<8x128xf32, #tpu.memory_space<vmem>>, vector<8x128xf32>
    tpu.vector_store %arg4[%c0_5, %c0_6], %8 {strides = array<i32>} : memref<8x128xf32, #tpu.memory_space<vmem>>, vector<8x128xf32>,
    return
  }
  func.func @transform_0(%arg0: i32) -> (i32, i32) {
    %c0_i32 = arith.constant 0 : i32
    %c0_i32_0 = arith.constant 0 : i32
    return %c0_i32, %arg0 : i32, i32
  }
  func.func @transform_1(%arg0: i32) -> (i32, i32) {
    %c0_i32 = arith.constant 0 : i32
    %c0_i32_0 = arith.constant 0 : i32
    %c0_i32_1 = arith.constant 0 : i32
    return %c0_i32, %c0_i32_0 : i32, i32
  }
  func.func @transform_2(%arg0: i32) -> (i32, i32) {
    %c0_i32 = arith.constant 0 : i32
    %c0_i32_0 = arith.constant 0 : i32
    %c0_i32_1 = arith.constant 0 : i32
    return %c0_i32, %c0_i32_0 : i32, i32
  }
  func.func @transform_3(%arg0: i32) -> (i32, i32) {
    %c0_i32 = arith.constant 0 : i32
    %c0_i32_0 = arith.constant 0 : i32
    return %c0_i32, %arg0 : i32, i32
  }
}

</mosaic_0001>

<bundles_post_ra>
// kernel: downsample_block.3
= control target key start
LH: loop header
LB: loop body
LE: loop exit
PB: predicated region body
PF: predicated region fallthrough
CT: control target
= control target key end

     0   :  { %v37_v0 = vmov 0   ;;  %s70_s1 = inlined_call_operand.vmem [shape: f32[8,1], index: 1, kind: input, shape index: {}]   ;;  %s71_s2 = inlined_call_operand.vmem [shape: f32[8,1], index: 2, kind: input, shape index: {}]   ;;  %s72_s0 = inlined_call_operand.vmem [shape: f32[8,128], index: 0, kind: input, shape index: {}]   ;;  %s73_s3 = inlined_call_operand.vmem [shape: f32[8,128], index: 3, kind: output, shape index: {}]  }
   0x1   :  { %36 = vset.pattern.permute.xlu0 %v37_v0  ;;  %v15_v1 = vld [vmem:[%s70_s1] sm:$0xff] }
   0x2   :  { %18 = vperm.xlu0 %36, %v15_v1   ;;  %v22_v2 = vld [vmem:[%s71_s2] sm:$0xff] }
   0x3   :  { %v14_v4 = vld [vmem:[%s72_s0] sm:$0xff] }
   0xa   :  { %25 = vperm.xlu0 %36, %v22_v2  }
  0x74   :  { %v19_v3 = vpop.permute.xlu0 %18 }
  0x75   :  { %v21_v5 = vmul.f32 %v19_v3, %v14_v4 }
  0x7c   :  { %v26_v6 = vpop.permute.xlu0 %25 }
  0x7d   :  { %v28_v7 = vadd.f32 %v26_v6, %v21_v5 }
  0x7f   :  { %v29_v8 = vmax.f32 %v28_v7, 0.0 }
  0x81   :  { %30 = vst [vmem:[%s73_s3] sm:$0xff] %v29_v8 }

// kernel: downsample_block.2
= control target key start
LH: loop header
LB: loop body
LE: loop exit
PB: predicated region body
PF: predicated region fallthrough
CT: control target
= control target key end

     0   :  { %vm40_vm0 = vcmask 392192   ;;  %vm60_vm1 = vcmask 7168   ;;  %s140_s0 = inlined_call_operand.vmem [shape: bf16[48,128], index: 0, kind: input, shape index: {}]   ;;  %s141_s1 = inlined_call_operand.vmem [shape: bf16[8,48], index: 1, kind: input, shape index: {}]   ;;  %s142_s2 = inlined_call_operand.vmem [shape: f32[8,128], index: 2, kind: output, shape index: {0}]   ;;  %s143_s3 = inlined_call_operand.vmem [shape: f32[1,8,1], index: 3, kind: output, shape index: {1}]   ;;  %s144_s4 = inlined_call_operand.vmem [shape: f32[1,8,1], index: 4, kind: output, shape index: {2}]  }
   0x1   :  { %v93_v0 = vld [vmem:[%s140_s0 + $0x10] sm:$0xff]  ;;  %v92_v1 = vld [vmem:[%s140_s0 + $0x8] sm:$0xff]  ;;  %v91_v2 = vld [vmem:[%s140_s0] sm:$0xff] }
   0x2   :  { %49 = vmatpush.bf16.msra.mxu0 %v93_v0  ;;  %v15_v3 = vld [vmem:[%s141_s1] sm:$0xf] }
   0x6   :  { %50 = vmatpush.bf16.msra.mxu0 %v92_v1 }
   0xa   :  { %51 = vmatpush.bf16.msra.mxu0 %v91_v2 }
   0xd   :  { %90 = vmatmul.msk.bf16.vlgmr.msra.gmra.mxu0 %vm40_vm0, %v15_v3 }
  0x8a   :  { %v53_v4 = vpop.f32.mrf.mxu0 }
  0x8b   :  { %57 = vst [vmem:[%s142_s2] sm:$0xff] %v53_v4  ;;  %58 = vadd.xlane.f32.xlu0 %v53_v4  ;;  %v62_v5 = vmul.f32 %v53_v4, %v53_v4 }
  0x92   :  { %v55_v6 = vpop.f32.mrf.mxu0 }
  0x93   :  { %63 = vadd.xlane.f32.xlu0 %v62_v5 }
  0xfe   :  { %v59_v7 = vpop.xlane.xlu0 %58 }
  0xff   :  { %61 = vst.msk [vmem:[%s143_s3] sm:$0xff] %vm60_vm1, %v59_v7 }
 0x106   :  { %v64_v8 = vpop.xlane.xlu0 %63 }
 0x107   :  { %65 = vst.msk [vmem:[%s144_s4] sm:$0xff] %vm60_vm1, %v64_v8 }

</bundles_post_ra>
